<compile_context>
chip_gen: v5e
topology: v5e:2x2
jax: 0.10.0
libtpu: 0.0.40
codegen_flags: <defaults>
</compile_context>

<pallas_src>
import functools

import jax
import jax.numpy as jnp
from jax.experimental import pallas as pl
from jax.experimental.pallas import tpu as pltpu


_OUT_SUBLANES = 8                       # f32 sublane tile height of the output slab
_RESIDENT_W_BUDGET = 24 * 1024 * 1024   # keep W resident only if 2 buffers fit here


def _round_up(x, m):
    return ((x + m - 1) // m) * m


def _sublane_min(dtype):
    # Minimum sublane tile height for a packed dtype: 8 (f32), 16 (bf16), 32 (8-bit).
    return max(8, 32 // jnp.dtype(dtype).itemsize)


def _pick_tile(total, requested, quantum):
    # `total` is a positive multiple of `quantum`; return the largest multiple
    # of `quantum` that divides `total` and does not exceed max(requested, quantum).
    t = min(_round_up(max(requested, quantum), quantum), total)
    while total % t:
        t -= quantum
    return t


def _dlo_kernel(x_ref, w_ref, b_ref, rw_ref, o_ref, acc_ref, *, block_k, w_resident):
    # x_ref : [TB, TK]          w_ref : [H_pad, LP] (resident) or [TK, LP] (streamed)
    # b_ref : [1, LP]           rw_ref: [TB, LP]
    # o_ref : [1, 8, TB] f32    acc_ref: [TB, LP] f32 scratch, resident across K
    k = pl.program_id(1)

    @pl.when(k == 0)
    def _():
        acc_ref[...] = jnp.zeros_like(acc_ref)

    if w_resident:
        k_off = pl.multiple_of(k * block_k, 128)
        w_tile = w_ref[pl.ds(k_off, block_k), :]
    else:
        w_tile = w_ref[...]

    # Partial logits for this K slice: [TB, TK] @ [TK, LP] on the MXU, f32 acc.
    acc_ref[...] += jnp.dot(x_ref[...], w_tile, preferred_element_type=jnp.float32)

    @pl.when(k == pl.num_programs(1) - 1)
    def _():
        # Once per batch block: add bias, apply routing weights, reduce over the
        # (zero-padded) layer axis.  All math in f32; store lane-dense.
        rw = rw_ref[...].astype(jnp.float32)
        logits = acc_ref[...] + b_ref[...].astype(jnp.float32)
        row = jnp.sum(logits * rw, axis=-1)                       # [TB]
        o_ref[...] = jnp.broadcast_to(row, o_ref.shape).astype(o_ref.dtype)


@functools.partial(jax.jit, static_argnames=("tb", "tk"))
def dynamic_layered_output(x, w_padded, b_padded, routing_weights, *, tb=512, tk=2048):
    """x: [B, H], w_padded: [H_pad, LP], b_padded: [1, LP] (pre-padded via
    pack_params / init_params), routing_weights: [B, L] -> [B] (f32)."""
    B, H = x.shape
    L = routing_weights.shape[1]
    H_pad, LP = w_padded.shape
    assert H_pad == _round_up(H, 128), (H, H_pad)
    assert LP == _round_up(L, 128) and b_padded.shape == (1, LP), (L, LP)

    # ---- tile geometry (dtype-aware sublane rounding) -----------------------
    sub = max(_sublane_min(x.dtype), _sublane_min(routing_weights.dtype))
    B_pad = _round_up(B, sub)
    TB = _pick_tile(B_pad, tb, sub)
    # v7x has 2 TensorCores: ensure the "parallel" batch axis has >= 2 blocks
    # whenever the batch is big enough to split.
    if B_pad // TB < 2:
        start = ((B_pad // 2) // sub) * sub
        for cand in range(start, 0, -sub):
            if B_pad % cand == 0:
                TB = cand
                break
    TK = _pick_tile(H_pad, tk, 128)
    n_b, n_k = B_pad // TB, H_pad // TK

    # ---- pad only the ragged edges (no copy when already aligned) -----------
    pad_b, pad_h, pad_l = B_pad - B, H_pad - H, LP - L
    xp = x if (pad_b == 0 and pad_h == 0) else jnp.pad(x, ((0, pad_b), (0, pad_h)))
    rwp = (routing_weights if (pad_b == 0 and pad_l == 0)
           else jnp.pad(routing_weights, ((0, pad_b), (0, pad_l))))

    # ---- W residency & VMEM budget -------------------------------------------
    w_itemsize = jnp.dtype(w_padded.dtype).itemsize
    w_resident = 2 * H_pad * LP * w_itemsize <= _RESIDENT_W_BUDGET
    if w_resident:
        w_spec = pl.BlockSpec((H_pad, LP), lambda i, k: (0, 0))   # DMA'd once
        w_bytes = 2 * H_pad * LP * w_itemsize
    else:
        w_spec = pl.BlockSpec((TK, LP), lambda i, k: (k, 0))      # streamed over K
        w_bytes = 2 * TK * LP * w_itemsize

    working = (2 * TB * TK * jnp.dtype(x.dtype).itemsize          # x double buffer
               + w_bytes                                          # W
               + 2 * TB * LP * jnp.dtype(rwp.dtype).itemsize      # routing weights
               + 2 * LP * jnp.dtype(b_padded.dtype).itemsize      # bias
               + 2 * _OUT_SUBLANES * TB * 4                       # output slab
               + TB * LP * 4)                                     # f32 accumulator
    try:
        vmem_cap = pltpu.get_tpu_info().vmem_capacity_bytes       # 64 MiB v7x, 128 MiB v5e/v6e
    except Exception:
        vmem_cap = 64 * 1024 * 1024                               # conservative (v7x) floor
    vmem_limit = int(min(vmem_cap * 3 // 4, max(2 * working + (4 << 20), 32 << 20)))

    kernel = functools.partial(_dlo_kernel, block_k=TK, w_resident=w_resident)

    out = pl.pallas_call(
        kernel,
        out_shape=jax.ShapeDtypeStruct((n_b, _OUT_SUBLANES, TB), jnp.float32),
        grid_spec=pltpu.PrefetchScalarGridSpec(
            num_scalar_prefetch=0,
            grid=(n_b, n_k),
            in_specs=[
                pl.BlockSpec((TB, TK), lambda i, k: (i, k)),      # x: streamed over B, K
                w_spec,                                           # W: resident (or streamed)
                pl.BlockSpec((1, LP), lambda i, k: (0, 0)),       # bias: resident
                pl.BlockSpec((TB, LP), lambda i, k: (i, 0)),      # routing: per batch block
            ],
            out_specs=pl.BlockSpec((1, _OUT_SUBLANES, TB), lambda i, k: (i, 0, 0)),
            scratch_shapes=[pltpu.VMEM((TB, LP), jnp.float32)],
        ),
        compiler_params=pltpu.CompilerParams(
            dimension_semantics=("parallel", "arbitrary"),
            vmem_limit_bytes=vmem_limit,
        ),
    )(xp, w_padded, b_padded, rwp)

    # Each (8, TB) slab holds the block's result broadcast over sublanes; take
    # sublane 0, drop batch padding.  Output stays f32.
    return out[:, 0, :].reshape(B_pad)[:B]


def pack_params(w_layers, b_layers):
    """One-time prepare step: pay the lane/sublane padding cost at init, not per forward.

    w_layers: [L, 1, H] (per-layer nn.Linear(H, 1).weight), b_layers: [L, 1].
    Returns W [H_pad, LP] and b [1, LP], zero-padded (padding contributes 0).
    """
    L, _, H = w_layers.shape
    H_pad, LP = _round_up(H, 128), _round_up(L, 128)
    w = jnp.zeros((H_pad, LP), w_layers.dtype).at[:H, :L].set(w_layers[:, 0, :].T)
    b = jnp.zeros((1, LP), b_layers.dtype).at[:, :L].set(b_layers.T)
    return w, b


def init_params(key, hidden_dim, num_layers, dtype=jnp.float32):
    """Deterministic init of L x Linear(hidden_dim, 1), pre-padded for the kernel."""
    kw, kb = jax.random.split(key)
    w_layers = jax.random.normal(kw, (num_layers, 1, hidden_dim), dtype) * 0.05
    b_layers = jax.random.normal(kb, (num_layers, 1), dtype) * 0.05
    return pack_params(w_layers, b_layers)


def reference(x, w, b, routing_weights):
    # Pure-JAX reference of the PyTorch forward (f32 math).
    logits = x.astype(jnp.float32) @ w.astype(jnp.float32) + b.astype(jnp.float32)
    return jnp.sum(logits * routing_weights.astype(jnp.float32), axis=-1)


if __name__ == "__main__":
    B, H, L = 16, 256, 4   # batch, hidden_dim, num_layers (small, but multi-tile)

    key = jax.random.PRNGKey(0)
    k_x, k_rw, k_p = jax.random.split(key, 3)

    x = jax.random.normal(k_x, (B, H), jnp.float32)
    routing_weights = jax.nn.softmax(
        jax.random.normal(k_rw, (B, L), jnp.float32), axis=-1)
    w_padded, b_padded = init_params(k_p, H, L)    # padded once, at init

    # f32 path: tb=8, tk=128 -> grid (2, 2): multiple batch blocks AND K accumulation.
    out = dynamic_layered_output(x, w_padded, b_padded, routing_weights, tb=8, tk=128)
    out = jax.block_until_ready(out)
    ref = reference(x, w_padded[:H, :L], b_padded[:, :L], routing_weights)
    assert out.shape == (B,), out.shape
    assert jnp.allclose(out, ref, atol=1e-4, rtol=1e-4), (out, ref)

    # bf16 streaming path (16-sublane tiles); accumulation / epilogue stay f32.
    xb = x.astype(jnp.bfloat16)
    rwb = routing_weights.astype(jnp.bfloat16)
    wb = w_padded.astype(jnp.bfloat16)
    bb = b_padded.astype(jnp.bfloat16)
    out_b = jax.block_until_ready(
        dynamic_layered_output(xb, wb, bb, rwb, tb=16, tk=128))
    ref_b = reference(xb, wb[:H, :L], bb[:, :L], rwb)
    assert out_b.shape == (B,), out_b.shape
    assert jnp.allclose(out_b, ref_b, atol=2e-3, rtol=2e-3), (out_b, ref_b)

    print("KERNEL_OK")
</pallas_src>

<mosaic_0001>
module attributes {stable_mosaic.version = 11 : i64} {
  func.func @_dlo_kernel(%arg0: i32, %arg1: i32, %arg2: memref<8x128xf32, #tpu.memory_space<vmem>>, %arg3: memref<256x128xf32, #tpu.memory_space<vmem>>, %arg4: memref<1x128xf32, #tpu.memory_space<vmem>>, %arg5: memref<8x128xf32, #tpu.memory_space<vmem>>, %arg6: memref<1x8x8xf32, #tpu.memory_space<vmem>>, %arg7: memref<8x128xf32, #tpu.memory_space<vmem>>) attributes {dimension_semantics = [#tpu.dimension_semantics<parallel>, #tpu.dimension_semantics<arbitrary>], iteration_bounds = array<i64: 2, 2>, scalar_prefetch = 0 : i64, scratch_operands = 1 : i64, tpu.core_type = #tpu.core_type<tc>, window_params = [{transform_indices = @transform_0, window_bounds = array<i64: 8, 128>}, {pipeline_mode = #tpu.pipeline_mode<synchronous>, transform_indices = @transform_1, window_bounds = array<i64: 256, 128>}, {pipeline_mode = #tpu.pipeline_mode<synchronous>, transform_indices = @transform_2, window_bounds = array<i64: 1, 128>}, {transform_indices = @transform_3, window_bounds = array<i64: 8, 128>}, {transform_indices = @transform_4, window_bounds = array<i64: 1, 8, 8>}]} {
    %c0_i32 = arith.constant 0 : i32
    %0 = arith.cmpi eq, %arg1, %c0_i32 : i32
    %1 = arith.extui %0 : i1 to i32
    %c0_i32_0 = arith.constant 0 : i32
    %2 = arith.cmpi ne, %1, %c0_i32_0 : i32
    scf.if %2 {
      %cst_8 = arith.constant 0.000000e+00 : f32
      %15 = vector.broadcast %cst_8 : f32 to vector<8x128xf32>
      %c0_9 = arith.constant 0 : index
      %c0_10 = arith.constant 0 : index
      %16 = vector.load %arg7[%c0_9, %c0_10] : memref<8x128xf32, #tpu.memory_space<vmem>>, vector<8x128xf32>
      tpu.vector_store %arg7[%c0_9, %c0_10], %15 {strides = array<i32>} : memref<8x128xf32, #tpu.memory_space<vmem>>, vector<8x128xf32>,
    } else {
    }
    %c128_i32 = arith.constant 128 : i32
    %3 = arith.muli %arg1, %c128_i32 : i32
    %4 = tpu.assume_multiple %3, 128 : i32
    %5 = arith.index_cast %4 : i32 to index
    %c0 = arith.constant 0 : index
    %6 = vector.load %arg3[%5, %c0] : memref<256x128xf32, #tpu.memory_space<vmem>>, vector<128x128xf32>
    %c0_1 = arith.constant 0 : index
    %c0_2 = arith.constant 0 : index
    %7 = vector.load %arg7[%c0_1, %c0_2] : memref<8x128xf32, #tpu.memory_space<vmem>>, vector<8x128xf32>
    %c0_3 = arith.constant 0 : index
    %c0_4 = arith.constant 0 : index
    %8 = vector.load %arg2[%c0_3, %c0_4] : memref<8x128xf32, #tpu.memory_space<vmem>>, vector<8x128xf32>
    %cst = arith.constant dense<0.000000e+00> : vector<8x128xf32>
    %9 = tpu.matmul %8, %6, %cst {dimension_numbers = #tpu.dot_dimension_numbers<[1], [0], [0], [1], [0, 0, 1, 1], [], []>} : vector<8x128xf32>, vector<128x128xf32>, vector<8x128xf32> -> vector<8x128xf32>
    %10 = arith.addf %7, %9 : vector<8x128xf32>
    %c0_5 = arith.constant 0 : index
    %c0_6 = arith.constant 0 : index
    %11 = vector.load %arg7[%c0_5, %c0_6] : memref<8x128xf32, #tpu.memory_space<vmem>>, vector<8x128xf32>
    tpu.vector_store %arg7[%c0_5, %c0_6], %10 {strides = array<i32>} : memref<8x128xf32, #tpu.memory_space<vmem>>, vector<8x128xf32>,
    %c1_i32 = arith.constant 1 : i32
    %12 = arith.cmpi eq, %arg1, %c1_i32 : i32
    %13 = arith.extui %12 : i1 to i32
    %c0_i32_7 = arith.constant 0 : i32
    %14 = arith.cmpi ne, %13, %c0_i32_7 : i32
    scf.if %14 {
      %c0_8 = arith.constant 0 : index
      %c0_9 = arith.constant 0 : index
      %15 = vector.load %arg5[%c0_8, %c0_9] : memref<8x128xf32, #tpu.memory_space<vmem>>, vector<8x128xf32>
      %c0_10 = arith.constant 0 : index
      %c0_11 = arith.constant 0 : index
      %16 = vector.load %arg7[%c0_10, %c0_11] : memref<8x128xf32, #tpu.memory_space<vmem>>, vector<8x128xf32>
      %c0_12 = arith.constant 0 : index
      %c0_13 = arith.constant 0 : index
      %17 = vector.load %arg4[%c0_12, %c0_13] : memref<1x128xf32, #tpu.memory_space<vmem>>, vector<1x128xf32>
      %18 = vector.broadcast %17 : vector<1x128xf32> to vector<8x128xf32>
      %19 = arith.addf %16, %18 : vector<8x128xf32>
      %20 = arith.mulf %19, %15 : vector<8x128xf32>
      %cst_14 = arith.constant dense<0.000000e+00> : vector<8xf32>
      %21 = vector.multi_reduction <add>, %20, %cst_14 [1] : vector<8x128xf32> to vector<8xf32>
      %22 = vector.shape_cast %21 : vector<8xf32> to vector<1x1x8xf32>
      %23 = vector.broadcast %22 : vector<1x1x8xf32> to vector<1x8x8xf32>
      %c0_15 = arith.constant 0 : index
      %c0_16 = arith.constant 0 : index
      %c0_17 = arith.constant 0 : index
      %24 = vector.load %arg6[%c0_15, %c0_16, %c0_17] : memref<1x8x8xf32, #tpu.memory_space<vmem>>, vector<1x8x8xf32>
      tpu.vector_store %arg6[%c0_15, %c0_16, %c0_17], %23 {strides = array<i32>} : memref<1x8x8xf32, #tpu.memory_space<vmem>>, vector<1x8x8xf32>,
    } else {
    }
    return
  }
  func.func @transform_0(%arg0: i32, %arg1: i32) -> (i32, i32) {
    %c0_i32 = arith.constant 0 : i32
    return %arg0, %arg1 : i32, i32
  }
  func.func @transform_1(%arg0: i32, %arg1: i32) -> (i32, i32) {
    %c0_i32 = arith.constant 0 : i32
    %c0_i32_0 = arith.constant 0 : i32
    %c0_i32_1 = arith.constant 0 : i32
    return %c0_i32, %c0_i32_0 : i32, i32
  }
  func.func @transform_2(%arg0: i32, %arg1: i32) -> (i32, i32) {
    %c0_i32 = arith.constant 0 : i32
    %c0_i32_0 = arith.constant 0 : i32
    %c0_i32_1 = arith.constant 0 : i32
    return %c0_i32, %c0_i32_0 : i32, i32
  }
  func.func @transform_3(%arg0: i32, %arg1: i32) -> (i32, i32) {
    %c0_i32 = arith.constant 0 : i32
    %c0_i32_0 = arith.constant 0 : i32
    return %arg0, %c0_i32 : i32, i32
  }
  func.func @transform_4(%arg0: i32, %arg1: i32) -> (i32, i32, i32) {
    %c0_i32 = arith.constant 0 : i32
    %c0_i32_0 = arith.constant 0 : i32
    %c0_i32_1 = arith.constant 0 : i32
    return %arg0, %c0_i32, %c0_i32_0 : i32, i32, i32
  }
}

</mosaic_0001>

<bundles_post_ra>
// kernel: squeeze.1
= control target key start
LH: loop header
LB: loop body
LE: loop exit
PB: predicated region body
PF: predicated region fallthrough
CT: control target
= control target key end

     0   :  { %s80_s0 = inlined_call_operand.vmem [shape: f32[2,8], index: 0, kind: input, shape index: {}]   ;;  %s81_s1 = inlined_call_operand.hbm [shape: f32[16], index: 1, kind: output, shape index: {}]  }
   0x1   :  { %v5_v0 = vld [vmem:[%s80_s0] sm:$0x3] }
   0x2   :  { %2 = vsyncpa [#allocation1], 0  ;;  %6 = vst [vmem:[#allocation3] sm:$0x3] %v5_v0  ;;  %vm8_vm0 = vcmask 64512   ;;  %s62_s0 = smov 8  }
   0x3   :  { %vm14_vm1 = vcmask 130112   ;;  %s63_s8 = smov [#allocation0]   ;;  %s27_s1 = sshll.u32 %s81_s1, 4  ;;  %s28_s1 = int_to_ptr.hbm [resolvable:$true] %s27_s1 }
   0x4   :  { %s25_s9 = sshll.u32 %s63_s8, 4  ;;  %s26_s9 = int_to_ptr.vmem [resolvable:$true] %s25_s9 }
   0x9   :  { %v11_v1 = vld [vmem:[#allocation3 + $0x1] sm:$0x1]   ;;  %v7_v2 = vld [vmem:[#allocation3] sm:$0x1]  }
   0xa   :  { %12 = vrot.lane.b32.xlu0 %v11_v1, %s62_s0  ;;  %9 = vst.msk [vmem:[#allocation2] sm:$0x1] %vm8_vm0, %v7_v2  }
  0x7c   :  { %v13_v3 = vpop.permute.xlu0 %12  }
  0x7d   :  { %15 = vst.msk [vmem:[#allocation2] sm:$0x1] %vm14_vm1, %v13_v3  }
  0x84   :  { %v18_v4 = vld [vmem:[#allocation2] sm:$0x1] }
  0x85   :  { %21 = vst [vmem:[#allocation0] sm:$0x1] %v18_v4 }
  0x86   :  { %30 = dma.vmem_to_hbm [thread:$0]  %s26_s9, 16, %s28_s1, [#allocation1]  }
  0x87   :  { %60 = dma.done.wait [#allocation1], 16  }
  0x88   :  { %61 = vsyncadd [#allocation1], 4294967280 }
  0x89   :  { %33 = vsyncpa [#allocation1], 1 }

</bundles_post_ra>
